<compile_context>
chip_gen: v7x
topology: tpu7x:2x2x1
jax: 0.10.0
libtpu: 0.0.40
codegen_flags: <defaults>
</compile_context>

<pallas_src>
import jax
import jax.numpy as jnp
from jax import lax
from jax.experimental import pallas as pl
from jax.experimental.pallas import tpu as pltpu

N, C, H, W = 2, 4, 16, 16
COUT, KH, KW = 8, 3, 3
DOUT = 16


def _make_fused_kernel(n_batch, c_in, hh, ww):
    """Fused conv(9 rolled taps) + bias + ReLU + global-mean-pool + linear.

    All intermediates are kept transposed (features on sublanes, positions on
    lanes) so the big (COUT, N*H*W) intermediate is fully lane-dense.
    """
    hw = hh * ww
    nhw = n_batch * hw
    pad_h, pad_w = KH // 2, KW // 2
    # H and W are powers of two for this model -> lane coordinate math is pure
    # shift/and (TPU vector integer divide is not a thing we want to rely on).
    assert (hh & (hh - 1)) == 0 and (ww & (ww - 1)) == 0
    w_shift = ww.bit_length() - 1

    def kernel(x_ref, w1_ref, b1_ref, w2T_ref, b2T_ref, oT_ref):
        x_f = x_ref[...]                                           # (C, N*H*W) f32

        # Per-lane (y, x) coordinates: col = n*H*W + y*W + x, H/W are po2.
        lane = lax.broadcasted_iota(jnp.int32, (c_in, nhw), 1)
        xx = jnp.bitwise_and(lane, ww - 1)
        yy = jnp.bitwise_and(jnp.right_shift(lane, w_shift), hh - 1)

        # Conv2d(pad=1) as 9 lane-rolls (XLU) + masked zero padding + 9 small
        # bf16 MXU dots accumulated in f32:  hT = sum_k w1[k] @ shift_k(x).
        hT = None
        for k, (dy, dx) in enumerate(
                (dy, dx) for dy in range(KH) for dx in range(KW)):
            sy, sx = dy - pad_h, dx - pad_w
            off = sy * ww + sx                     # source col = target col + off
            if off != 0:
                # jnp.roll semantics: result[col] = x[(col - shift) % nhw]
                shifted = pltpu.roll(x_f, shift=(-off) % nhw, axis=1)
            else:
                shifted = x_f
            conds = []
            if sy < 0:
                conds.append(yy >= -sy)
            elif sy > 0:
                conds.append(yy < hh - sy)
            if sx < 0:
                conds.append(xx >= -sx)
            elif sx > 0:
                conds.append(xx < ww - sx)
            if conds:
                m = conds[0]
                for cnd in conds[1:]:
                    m = m & cnd
                shifted = jnp.where(m, shifted, 0.0)   # implicit zero padding
            term = jnp.dot(w1_ref[k], shifted.astype(jnp.bfloat16),
                           preferred_element_type=jnp.float32)      # (COUT, N*H*W)
            hT = term if hT is None else hT + term

        # Bias + ReLU in f32 (v5e VPU has no bf16 path; f32 elementwise everywhere).
        hT = jnp.maximum(hT + b1_ref[...], 0.0)                    # (COUT, N*H*W)

        # Global average pool: columns are batch-major, hw is a multiple of 128,
        # so static lane-aligned slices + lane reductions (XLU) do the job.
        cols = [jnp.sum(hT[:, n * hw:(n + 1) * hw], axis=1, keepdims=True)
                for n in range(n_batch)]                            # n_batch x (COUT,1)
        pooledT = cols[0] if n_batch == 1 else jnp.concatenate(cols, axis=1)
        pooledT = pooledT * (1.0 / hw)                              # (COUT, N) f32

        # Final Linear, transposed & bf16 MXU operands, f32 accumulate:
        #   (DOUT, COUT) @ (COUT, N) + b -> (DOUT, N)
        oT_ref[...] = (jnp.dot(w2T_ref[...], pooledT.astype(jnp.bfloat16),
                               preferred_element_type=jnp.float32)
                       + b2T_ref[...])

    return kernel


def prepare_params(w_conv, b_conv, w_fc, b_fc):
    """One-time constant parameter reshuffle (hoisted out of the per-call path)."""
    # torch conv weight (COUT, CIN, KH, KW) -> (KH*KW, COUT, CIN); tap k = dy*KW+dx.
    w1 = (jnp.transpose(w_conv, (2, 3, 0, 1))
          .reshape(KH * KW, COUT, C).astype(jnp.bfloat16))   # MXU-native (all gens)
    b1 = b_conv.reshape(COUT, 1).astype(jnp.float32)
    w2T = w_fc.astype(jnp.bfloat16)                          # torch Linear weight (DOUT, COUT)
    b2T = b_fc.reshape(DOUT, 1).astype(jnp.float32)
    return w1, b1, w2T, b2T


@jax.jit
def forward_prepared(x_nchw, w1, b1, w2T, b2T):
    """x_nchw: (N, C, H, W) f32 -> (N, DOUT) f32."""
    n, c, hh, ww = x_nchw.shape
    hw = hh * ww

    # Lane-dense input layout: (C, N*H*W) f32, columns ordered (n, y, x).
    x_cn = jnp.transpose(x_nchw, (1, 0, 2, 3)).reshape(c, n * hw)

    def full_spec(shape):
        nd = len(shape)
        return pl.BlockSpec(shape, lambda i, _nd=nd: (0,) * _nd)

    oT = pl.pallas_call(
        _make_fused_kernel(n, c, hh, ww),
        grid=(1,),   # latency-bound at this size; see note re: v7x TC split when scaling
        in_specs=[
            full_spec(x_cn.shape), full_spec(w1.shape), full_spec(b1.shape),
            full_spec(w2T.shape), full_spec(b2T.shape),
        ],
        out_specs=full_spec((DOUT, n)),
        out_shape=jax.ShapeDtypeStruct((DOUT, n), jnp.float32),
        compiler_params=pltpu.CompilerParams(dimension_semantics=("arbitrary",)),
    )(x_cn, w1, b1, w2T, b2T)

    return oT.T                                                     # (N, DOUT)


def optimized_model_forward(x_nchw, w_conv, b_conv, w_fc, b_fc):
    """Convenience wrapper taking raw torch-layout parameters."""
    return forward_prepared(x_nchw, *prepare_params(w_conv, b_conv, w_fc, b_fc))


def reference_forward(x_nchw, w_conv, b_conv, w_fc, b_fc):
    """Pure-JAX f32 reference (matches the wrapped PyTorch model's forward)."""
    y = lax.conv_general_dilated(
        x_nchw, w_conv, window_strides=(1, 1), padding=((1, 1), (1, 1)),
        dimension_numbers=("NCHW", "OIHW", "NCHW"))
    y = jnp.maximum(y + b_conv.reshape(1, -1, 1, 1), 0.0)
    pooled = jnp.mean(y, axis=(2, 3))
    return pooled @ w_fc.T + b_fc


if __name__ == "__main__":
    key = jax.random.PRNGKey(0)
    kx, kw1, kb1, kw2, kb2 = jax.random.split(key, 5)

    x = jax.random.normal(kx, (N, C, H, W), dtype=jnp.float32)
    w_conv = jax.random.normal(kw1, (COUT, C, KH, KW), dtype=jnp.float32) * 0.1
    b_conv = jax.random.normal(kb1, (COUT,), dtype=jnp.float32) * 0.1
    w_fc = jax.random.normal(kw2, (DOUT, COUT), dtype=jnp.float32) * 0.1
    b_fc = jax.random.normal(kb2, (DOUT,), dtype=jnp.float32) * 0.1

    # Constant parameter reshuffles done exactly once, outside the call path.
    params = prepare_params(w_conv, b_conv, w_fc, b_fc)

    out = forward_prepared(x, *params)
    out = jax.block_until_ready(out)

    ref = reference_forward(x, w_conv, b_conv, w_fc, b_fc)
    assert out.shape == (N, DOUT)
    # Tolerance sized for bf16 MXU operands (f32 accumulation / f32 elementwise).
    assert jnp.allclose(out, ref, atol=5e-3, rtol=1e-2), "Pallas kernel mismatch vs reference"

    print("KERNEL_OK")
</pallas_src>

<mosaic_0001>
module attributes {stable_mosaic.version = 11 : i64} {
  func.func @kernel(%arg0: i32, %arg1: memref<4x512xf32, #tpu.memory_space<vmem>>, %arg2: memref<9x8x4xbf16, #tpu.memory_space<vmem>>, %arg3: memref<8x1xf32, #tpu.memory_space<vmem>>, %arg4: memref<16x8xbf16, #tpu.memory_space<vmem>>, %arg5: memref<16x1xf32, #tpu.memory_space<vmem>>, %arg6: memref<16x2xf32, #tpu.memory_space<vmem>>) attributes {dimension_semantics = [#tpu.dimension_semantics<arbitrary>], iteration_bounds = array<i64: 1>, scalar_prefetch = 0 : i64, scratch_operands = 0 : i64, tpu.core_type = #tpu.core_type<tc>, window_params = [{pipeline_mode = #tpu.pipeline_mode<synchronous>, transform_indices = @transform_0, window_bounds = array<i64: 4, 512>}, {pipeline_mode = #tpu.pipeline_mode<synchronous>, transform_indices = @transform_1, window_bounds = array<i64: 9, 8, 4>}, {pipeline_mode = #tpu.pipeline_mode<synchronous>, transform_indices = @transform_2, window_bounds = array<i64: 8, 1>}, {pipeline_mode = #tpu.pipeline_mode<synchronous>, transform_indices = @transform_3, window_bounds = array<i64: 16, 8>}, {pipeline_mode = #tpu.pipeline_mode<synchronous>, transform_indices = @transform_4, window_bounds = array<i64: 16, 1>}, {pipeline_mode = #tpu.pipeline_mode<synchronous>, transform_indices = @transform_5, window_bounds = array<i64: 16, 2>}]} {
    %c0 = arith.constant 0 : index
    %c0_0 = arith.constant 0 : index
    %0 = vector.load %arg1[%c0, %c0_0] : memref<4x512xf32, #tpu.memory_space<vmem>>, vector<4x512xf32>
    %1 = tpu.iota {dimensions = array<i32: 1>} : vector<4x512xi32>
    %c15_i32 = arith.constant 15 : i32
    %2 = vector.broadcast %c15_i32 : i32 to vector<4x512xi32>
    %3 = arith.andi %1, %2 : vector<4x512xi32>
    %c4_i32 = arith.constant 4 : i32
    %4 = vector.broadcast %c4_i32 : i32 to vector<4x512xi32>
    %5 = arith.shrsi %1, %4 : vector<4x512xi32>
    %c15_i32_1 = arith.constant 15 : i32
    %6 = vector.broadcast %c15_i32_1 : i32 to vector<4x512xi32>
    %7 = arith.andi %5, %6 : vector<4x512xi32>
    %c17_i32 = arith.constant 17 : i32
    %8 = tpu.dynamic_rotate %0 by %c17_i32 dim 1 : vector<4x512xf32>, i32 -> vector<4x512xf32>
    %c1_i32 = arith.constant 1 : i32
    %9 = vector.broadcast %c1_i32 : i32 to vector<4x512xi32>
    %10 = arith.cmpi sge, %7, %9 : vector<4x512xi32>
    %c1_i32_2 = arith.constant 1 : i32
    %11 = vector.broadcast %c1_i32_2 : i32 to vector<4x512xi32>
    %12 = arith.cmpi sge, %3, %11 : vector<4x512xi32>
    %13 = arith.andi %10, %12 : vector<4x512xi1>
    %cst = arith.constant 0.000000e+00 : f32
    %14 = vector.broadcast %cst : f32 to vector<4x512xf32>
    %15 = arith.select %13, %8, %14 : vector<4x512xi1>, vector<4x512xf32>
    %c0_3 = arith.constant 0 : index
    %c0_4 = arith.constant 0 : index
    %c0_5 = arith.constant 0 : index
    %16 = vector.load %arg2[%c0_3, %c0_4, %c0_5] : memref<9x8x4xbf16, #tpu.memory_space<vmem>>, vector<1x8x4xbf16>
    %17 = vector.shape_cast %16 : vector<1x8x4xbf16> to vector<8x4xbf16>
    %18 = arith.truncf %15 : vector<4x512xf32> to vector<4x512xbf16>
    %cst_6 = arith.constant dense<0.000000e+00> : vector<8x512xf32>
    %19 = tpu.matmul %17, %18, %cst_6 {dimension_numbers = #tpu.dot_dimension_numbers<[1], [0], [0], [1], [0, 0, 1, 1], [], []>} : vector<8x4xbf16>, vector<4x512xbf16>, vector<8x512xf32> -> vector<8x512xf32>
    %c16_i32 = arith.constant 16 : i32
    %20 = tpu.dynamic_rotate %0 by %c16_i32 dim 1 : vector<4x512xf32>, i32 -> vector<4x512xf32>
    %c1_i32_7 = arith.constant 1 : i32
    %21 = vector.broadcast %c1_i32_7 : i32 to vector<4x512xi32>
    %22 = arith.cmpi sge, %7, %21 : vector<4x512xi32>
    %cst_8 = arith.constant 0.000000e+00 : f32
    %23 = vector.broadcast %cst_8 : f32 to vector<4x512xf32>
    %24 = arith.select %22, %20, %23 : vector<4x512xi1>, vector<4x512xf32>
    %c1 = arith.constant 1 : index
    %c0_9 = arith.constant 0 : index
    %c0_10 = arith.constant 0 : index
    %25 = vector.load %arg2[%c1, %c0_9, %c0_10] : memref<9x8x4xbf16, #tpu.memory_space<vmem>>, vector<1x8x4xbf16>
    %26 = vector.shape_cast %25 : vector<1x8x4xbf16> to vector<8x4xbf16>
    %27 = arith.truncf %24 : vector<4x512xf32> to vector<4x512xbf16>
    %cst_11 = arith.constant dense<0.000000e+00> : vector<8x512xf32>
    %28 = tpu.matmul %26, %27, %cst_11 {dimension_numbers = #tpu.dot_dimension_numbers<[1], [0], [0], [1], [0, 0, 1, 1], [], []>} : vector<8x4xbf16>, vector<4x512xbf16>, vector<8x512xf32> -> vector<8x512xf32>
    %29 = arith.addf %19, %28 : vector<8x512xf32>
    %c15_i32_12 = arith.constant 15 : i32
    %30 = tpu.dynamic_rotate %0 by %c15_i32_12 dim 1 : vector<4x512xf32>, i32 -> vector<4x512xf32>
    %c1_i32_13 = arith.constant 1 : i32
    %31 = vector.broadcast %c1_i32_13 : i32 to vector<4x512xi32>
    %32 = arith.cmpi sge, %7, %31 : vector<4x512xi32>
    %c15_i32_14 = arith.constant 15 : i32
    %33 = vector.broadcast %c15_i32_14 : i32 to vector<4x512xi32>
    %34 = arith.cmpi slt, %3, %33 : vector<4x512xi32>
    %35 = arith.andi %32, %34 : vector<4x512xi1>
    %cst_15 = arith.constant 0.000000e+00 : f32
    %36 = vector.broadcast %cst_15 : f32 to vector<4x512xf32>
    %37 = arith.select %35, %30, %36 : vector<4x512xi1>, vector<4x512xf32>
    %c2 = arith.constant 2 : index
    %c0_16 = arith.constant 0 : index
    %c0_17 = arith.constant 0 : index
    %38 = vector.load %arg2[%c2, %c0_16, %c0_17] : memref<9x8x4xbf16, #tpu.memory_space<vmem>>, vector<1x8x4xbf16>
    %39 = vector.shape_cast %38 : vector<1x8x4xbf16> to vector<8x4xbf16>
    %40 = arith.truncf %37 : vector<4x512xf32> to vector<4x512xbf16>
    %cst_18 = arith.constant dense<0.000000e+00> : vector<8x512xf32>
    %41 = tpu.matmul %39, %40, %cst_18 {dimension_numbers = #tpu.dot_dimension_numbers<[1], [0], [0], [1], [0, 0, 1, 1], [], []>} : vector<8x4xbf16>, vector<4x512xbf16>, vector<8x512xf32> -> vector<8x512xf32>
    %42 = arith.addf %29, %41 : vector<8x512xf32>
    %c1_i32_19 = arith.constant 1 : i32
    %43 = tpu.dynamic_rotate %0 by %c1_i32_19 dim 1 : vector<4x512xf32>, i32 -> vector<4x512xf32>
    %c1_i32_20 = arith.constant 1 : i32
    %44 = vector.broadcast %c1_i32_20 : i32 to vector<4x512xi32>
    %45 = arith.cmpi sge, %3, %44 : vector<4x512xi32>
    %cst_21 = arith.constant 0.000000e+00 : f32
    %46 = vector.broadcast %cst_21 : f32 to vector<4x512xf32>
    %47 = arith.select %45, %43, %46 : vector<4x512xi1>, vector<4x512xf32>
    %c3 = arith.constant 3 : index
    %c0_22 = arith.constant 0 : index
    %c0_23 = arith.constant 0 : index
    %48 = vector.load %arg2[%c3, %c0_22, %c0_23] : memref<9x8x4xbf16, #tpu.memory_space<vmem>>, vector<1x8x4xbf16>
    %49 = vector.shape_cast %48 : vector<1x8x4xbf16> to vector<8x4xbf16>
    %50 = arith.truncf %47 : vector<4x512xf32> to vector<4x512xbf16>
    %cst_24 = arith.constant dense<0.000000e+00> : vector<8x512xf32>
    %51 = tpu.matmul %49, %50, %cst_24 {dimension_numbers = #tpu.dot_dimension_numbers<[1], [0], [0], [1], [0, 0, 1, 1], [], []>} : vector<8x4xbf16>, vector<4x512xbf16>, vector<8x512xf32> -> vector<8x512xf32>
    %52 = arith.addf %42, %51 : vector<8x512xf32>
    %c4 = arith.constant 4 : index
    %c0_25 = arith.constant 0 : index
    %c0_26 = arith.constant 0 : index
    %53 = vector.load %arg2[%c4, %c0_25, %c0_26] : memref<9x8x4xbf16, #tpu.memory_space<vmem>>, vector<1x8x4xbf16>
    %54 = vector.shape_cast %53 : vector<1x8x4xbf16> to vector<8x4xbf16>
    %55 = arith.truncf %0 : vector<4x512xf32> to vector<4x512xbf16>
    %cst_27 = arith.constant dense<0.000000e+00> : vector<8x512xf32>
    %56 = tpu.matmul %54, %55, %cst_27 {dimension_numbers = #tpu.dot_dimension_numbers<[1], [0], [0], [1], [0, 0, 1, 1], [], []>} : vector<8x4xbf16>, vector<4x512xbf16>, vector<8x512xf32> -> vector<8x512xf32>
    %57 = arith.addf %52, %56 : vector<8x512xf32>
    %c511_i32 = arith.constant 511 : i32
    %58 = tpu.dynamic_rotate %0 by %c511_i32 dim 1 : vector<4x512xf32>, i32 -> vector<4x512xf32>
    %c15_i32_28 = arith.constant 15 : i32
    %59 = vector.broadcast %c15_i32_28 : i32 to vector<4x512xi32>
    %60 = arith.cmpi slt, %3, %59 : vector<4x512xi32>
    %cst_29 = arith.constant 0.000000e+00 : f32
    %61 = vector.broadcast %cst_29 : f32 to vector<4x512xf32>
    %62 = arith.select %60, %58, %61 : vector<4x512xi1>, vector<4x512xf32>
    %c5 = arith.constant 5 : index
    %c0_30 = arith.constant 0 : index
    %c0_31 = arith.constant 0 : index
    %63 = vector.load %arg2[%c5, %c0_30, %c0_31] : memref<9x8x4xbf16, #tpu.memory_space<vmem>>, vector<1x8x4xbf16>
    %64 = vector.shape_cast %63 : vector<1x8x4xbf16> to vector<8x4xbf16>
    %65 = arith.truncf %62 : vector<4x512xf32> to vector<4x512xbf16>
    %cst_32 = arith.constant dense<0.000000e+00> : vector<8x512xf32>
    %66 = tpu.matmul %64, %65, %cst_32 {dimension_numbers = #tpu.dot_dimension_numbers<[1], [0], [0], [1], [0, 0, 1, 1], [], []>} : vector<8x4xbf16>, vector<4x512xbf16>, vector<8x512xf32> -> vector<8x512xf32>
    %67 = arith.addf %57, %66 : vector<8x512xf32>
    %c497_i32 = arith.constant 497 : i32
    %68 = tpu.dynamic_rotate %0 by %c497_i32 dim 1 : vector<4x512xf32>, i32 -> vector<4x512xf32>
    %c15_i32_33 = arith.constant 15 : i32
    %69 = vector.broadcast %c15_i32_33 : i32 to vector<4x512xi32>
    %70 = arith.cmpi slt, %7, %69 : vector<4x512xi32>
    %c1_i32_34 = arith.constant 1 : i32
    %71 = vector.broadcast %c1_i32_34 : i32 to vector<4x512xi32>
    %72 = arith.cmpi sge, %3, %71 : vector<4x512xi32>
    %73 = arith.andi %70, %72 : vector<4x512xi1>
    %cst_35 = arith.constant 0.000000e+00 : f32
    %74 = vector.broadcast %cst_35 : f32 to vector<4x512xf32>
    %75 = arith.select %73, %68, %74 : vector<4x512xi1>, vector<4x512xf32>
    %c6 = arith.constant 6 : index
    %c0_36 = arith.constant 0 : index
    %c0_37 = arith.constant 0 : index
    %76 = vector.load %arg2[%c6, %c0_36, %c0_37] : memref<9x8x4xbf16, #tpu.memory_space<vmem>>, vector<1x8x4xbf16>
    %77 = vector.shape_cast %76 : vector<1x8x4xbf16> to vector<8x4xbf16>
    %78 = arith.truncf %75 : vector<4x512xf32> to vector<4x512xbf16>
    %cst_38 = arith.constant dense<0.000000e+00> : vector<8x512xf32>
    %79 = tpu.matmul %77, %78, %cst_38 {dimension_numbers = #tpu.dot_dimension_numbers<[1], [0], [0], [1], [0, 0, 1, 1], [], []>} : vector<8x4xbf16>, vector<4x512xbf16>, vector<8x512xf32> -> vector<8x512xf32>
    %80 = arith.addf %67, %79 : vector<8x512xf32>
    %c496_i32 = arith.constant 496 : i32
    %81 = tpu.dynamic_rotate %0 by %c496_i32 dim 1 : vector<4x512xf32>, i32 -> vector<4x512xf32>
    %c15_i32_39 = arith.constant 15 : i32
    %82 = vector.broadcast %c15_i32_39 : i32 to vector<4x512xi32>
    %83 = arith.cmpi slt, %7, %82 : vector<4x512xi32>
    %cst_40 = arith.constant 0.000000e+00 : f32
    %84 = vector.broadcast %cst_40 : f32 to vector<4x512xf32>
    %85 = arith.select %83, %81, %84 : vector<4x512xi1>, vector<4x512xf32>
    %c7 = arith.constant 7 : index
    %c0_41 = arith.constant 0 : index
    %c0_42 = arith.constant 0 : index
    %86 = vector.load %arg2[%c7, %c0_41, %c0_42] : memref<9x8x4xbf16, #tpu.memory_space<vmem>>, vector<1x8x4xbf16>
    %87 = vector.shape_cast %86 : vector<1x8x4xbf16> to vector<8x4xbf16>
    %88 = arith.truncf %85 : vector<4x512xf32> to vector<4x512xbf16>
    %cst_43 = arith.constant dense<0.000000e+00> : vector<8x512xf32>
    %89 = tpu.matmul %87, %88, %cst_43 {dimension_numbers = #tpu.dot_dimension_numbers<[1], [0], [0], [1], [0, 0, 1, 1], [], []>} : vector<8x4xbf16>, vector<4x512xbf16>, vector<8x512xf32> -> vector<8x512xf32>
    %90 = arith.addf %80, %89 : vector<8x512xf32>
    %c495_i32 = arith.constant 495 : i32
    %91 = tpu.dynamic_rotate %0 by %c495_i32 dim 1 : vector<4x512xf32>, i32 -> vector<4x512xf32>
    %c15_i32_44 = arith.constant 15 : i32
    %92 = vector.broadcast %c15_i32_44 : i32 to vector<4x512xi32>
    %93 = arith.cmpi slt, %7, %92 : vector<4x512xi32>
    %c15_i32_45 = arith.constant 15 : i32
    %94 = vector.broadcast %c15_i32_45 : i32 to vector<4x512xi32>
    %95 = arith.cmpi slt, %3, %94 : vector<4x512xi32>
    %96 = arith.andi %93, %95 : vector<4x512xi1>
    %cst_46 = arith.constant 0.000000e+00 : f32
    %97 = vector.broadcast %cst_46 : f32 to vector<4x512xf32>
    %98 = arith.select %96, %91, %97 : vector<4x512xi1>, vector<4x512xf32>
    %c8 = arith.constant 8 : index
    %c0_47 = arith.constant 0 : index
    %c0_48 = arith.constant 0 : index
    %99 = vector.load %arg2[%c8, %c0_47, %c0_48] : memref<9x8x4xbf16, #tpu.memory_space<vmem>>, vector<1x8x4xbf16>
    %100 = vector.shape_cast %99 : vector<1x8x4xbf16> to vector<8x4xbf16>
    %101 = arith.truncf %98 : vector<4x512xf32> to vector<4x512xbf16>
    %cst_49 = arith.constant dense<0.000000e+00> : vector<8x512xf32>
    %102 = tpu.matmul %100, %101, %cst_49 {dimension_numbers = #tpu.dot_dimension_numbers<[1], [0], [0], [1], [0, 0, 1, 1], [], []>} : vector<8x4xbf16>, vector<4x512xbf16>, vector<8x512xf32> -> vector<8x512xf32>
    %103 = arith.addf %90, %102 : vector<8x512xf32>
    %c0_50 = arith.constant 0 : index
    %c0_51 = arith.constant 0 : index
    %104 = vector.load %arg3[%c0_50, %c0_51] : memref<8x1xf32, #tpu.memory_space<vmem>>, vector<8x1xf32>
    %105 = vector.broadcast %104 : vector<8x1xf32> to vector<8x512xf32>
    %106 = arith.addf %103, %105 : vector<8x512xf32>
    %cst_52 = arith.constant 0.000000e+00 : f32
    %107 = vector.broadcast %cst_52 : f32 to vector<8x512xf32>
    %108 = arith.maximumf %106, %107 : vector<8x512xf32>
    %109 = vector.extract_strided_slice %108 {offsets = [0, 0], sizes = [8, 256], strides = [1, 1]} : vector<8x512xf32> to vector<8x256xf32>
    %cst_53 = arith.constant dense<0.000000e+00> : vector<8xf32>
    %110 = vector.multi_reduction <add>, %109, %cst_53 [1] : vector<8x256xf32> to vector<8xf32>
    %111 = vector.shape_cast %110 : vector<8xf32> to vector<8x1xf32>
    %112 = vector.extract_strided_slice %108 {offsets = [0, 256], sizes = [8, 256], strides = [1, 1]} : vector<8x512xf32> to vector<8x256xf32>
    %cst_54 = arith.constant dense<0.000000e+00> : vector<8xf32>
    %113 = vector.multi_reduction <add>, %112, %cst_54 [1] : vector<8x256xf32> to vector<8xf32>
    %114 = vector.shape_cast %113 : vector<8xf32> to vector<8x1xf32>
    %115 = tpu.concatenate %111, %114 in 1 : vector<8x1xf32>, vector<8x1xf32> -> vector<8x2xf32>
    %cst_55 = arith.constant 3.906250e-03 : f32
    %116 = vector.broadcast %cst_55 : f32 to vector<8x2xf32>
    %117 = arith.mulf %115, %116 : vector<8x2xf32>
    %c0_56 = arith.constant 0 : index
    %c0_57 = arith.constant 0 : index
    %118 = vector.load %arg4[%c0_56, %c0_57] : memref<16x8xbf16, #tpu.memory_space<vmem>>, vector<16x8xbf16>
    %119 = arith.truncf %117 : vector<8x2xf32> to vector<8x2xbf16>
    %cst_58 = arith.constant dense<0.000000e+00> : vector<16x2xf32>
    %120 = tpu.matmul %118, %119, %cst_58 {dimension_numbers = #tpu.dot_dimension_numbers<[1], [0], [0], [1], [0, 0, 1, 1], [], []>} : vector<16x8xbf16>, vector<8x2xbf16>, vector<16x2xf32> -> vector<16x2xf32>
    %c0_59 = arith.constant 0 : index
    %c0_60 = arith.constant 0 : index
    %121 = vector.load %arg5[%c0_59, %c0_60] : memref<16x1xf32, #tpu.memory_space<vmem>>, vector<16x1xf32>
    %122 = vector.broadcast %121 : vector<16x1xf32> to vector<16x2xf32>
    %123 = arith.addf %120, %122 : vector<16x2xf32>
    %c0_61 = arith.constant 0 : index
    %c0_62 = arith.constant 0 : index
    %124 = vector.load %arg6[%c0_61, %c0_62] : memref<16x2xf32, #tpu.memory_space<vmem>>, vector<16x2xf32>
    tpu.vector_store %arg6[%c0_61, %c0_62], %123 {strides = array<i32>} : memref<16x2xf32, #tpu.memory_space<vmem>>, vector<16x2xf32>,
    return
  }
  func.func @transform_0(%arg0: i32) -> (i32, i32) {
    %c0_i32 = arith.constant 0 : i32
    %c0_i32_0 = arith.constant 0 : i32
    %c0_i32_1 = arith.constant 0 : i32
    return %c0_i32, %c0_i32_0 : i32, i32
  }
  func.func @transform_1(%arg0: i32) -> (i32, i32, i32) {
    %c0_i32 = arith.constant 0 : i32
    %c0_i32_0 = arith.constant 0 : i32
    %c0_i32_1 = arith.constant 0 : i32
    %c0_i32_2 = arith.constant 0 : i32
    return %c0_i32, %c0_i32_0, %c0_i32_1 : i32, i32, i32
  }
  func.func @transform_2(%arg0: i32) -> (i32, i32) {
    %c0_i32 = arith.constant 0 : i32
    %c0_i32_0 = arith.constant 0 : i32
    %c0_i32_1 = arith.constant 0 : i32
    return %c0_i32, %c0_i32_0 : i32, i32
  }
  func.func @transform_3(%arg0: i32) -> (i32, i32) {
    %c0_i32 = arith.constant 0 : i32
    %c0_i32_0 = arith.constant 0 : i32
    %c0_i32_1 = arith.constant 0 : i32
    return %c0_i32, %c0_i32_0 : i32, i32
  }
  func.func @transform_4(%arg0: i32) -> (i32, i32) {
    %c0_i32 = arith.constant 0 : i32
    %c0_i32_0 = arith.constant 0 : i32
    %c0_i32_1 = arith.constant 0 : i32
    return %c0_i32, %c0_i32_0 : i32, i32
  }
  func.func @transform_5(%arg0: i32) -> (i32, i32) {
    %c0_i32 = arith.constant 0 : i32
    %c0_i32_0 = arith.constant 0 : i32
    %c0_i32_1 = arith.constant 0 : i32
    return %c0_i32, %c0_i32_0 : i32, i32
  }
}

</mosaic_0001>

<bundles_post_ra>
// kernel: forward_prepared.1
= control target key start
LH: loop header
LB: loop body
LE: loop exit
PB: predicated region body
PF: predicated region fallthrough
CT: control target
= control target key end

     0   :  { %s1419_s22 = smov 16   ;;  %s1420_s23 = smov 17   ;;  %v1421_v6 = vmov 0   ;;  %v23_v8 = vlaneseq  ;;  %vm1870_vm2 = vcmask 1041408   ;;  %v1881_v27 = vmov 0  ;;  %s1862_s0 = inlined_call_operand.vmem [shape: f32[4,512], index: 0, kind: input, shape index: {}]   ;;  %s1863_s2 = inlined_call_operand.vmem [shape: f32[8,1], index: 2, kind: input, shape index: {}]   ;;  %s1864_s1 = inlined_call_operand.vmem [shape: bf16[9,8,4], index: 1, kind: input, shape index: {}]   ;;  %s1865_s4 = inlined_call_operand.vmem [shape: f32[16,1], index: 4, kind: input, shape index: {}]   ;;  %s1866_s3 = inlined_call_operand.vmem [shape: bf16[16,8], index: 3, kind: input, shape index: {}]   ;;  %s1867_s5 = inlined_call_operand.vmem [shape: f32[16,2], index: 5, kind: output, shape index: {}]  }
   0x1   :  { %v1463_v0 = vld [vmem:[%s1862_s0] sm:$0xff]  ;;  %v1468_v1 = vld [vmem:[%s1862_s0 + $0x8] sm:$0xff]  ;;  %152 = vmatprep.mubr.bf16.mxu0 %v1421_v6  ;;  %193 = vmatprep.mubr.bf16.mxu1 %v1421_v6  ;;  %s1422_s0 = smov 15   ;;  %s1423_s24 = smov 1   ;;  %v1885_v34 = vmov 0  ;;  %v1895_v51 = vmov 0 }
   0x2   :  { %v1472_v2 = vcombine.high %v1463_v0, %v1463_v0  ;;  %v1476_v3 = vcombine.high %v1468_v1, %v1468_v1  ;;  %1414 = vset.pattern.permute.xlu0 %v1421_v6  ;;  %1415 = vset.pattern.permute.xlu1 %v1421_v6  ;;  %s1424_s25 = smov 127   ;;  %s1425_s26 = smov 113   ;;  %v1170_v7 = vld [vmem:[%s1863_s2] sm:$0xff]  ;;  %v1489_v9 = vand.u32 127, %v23_v8  ;;  %v1303_v52 = vld [vmem:[%s1864_s1 + $0x1c] sm:$0xf] }
   0x3   :  { %s1426_s27 = smov 112   ;;  %s1427_s28 = smov 111  }
   0x4   :  { %v1334_v4 = vpack.i.bf16 %v1472_v2, %v1463_v0  ;;  %v1339_v5 = vpack.i.bf16 %v1476_v3, %v1468_v1  ;;  %v25_v10 = vadd.s32 128, %v1489_v9  ;;  %v27_v11 = vadd.s32 384, %v1489_v9 }
   0x5   :  { %v26_v12 = vadd.s32 256, %v1489_v9  ;;  %v32_v16 = vshra.s32 %v1489_v9, 4  ;;  %vm54_vm1 = vcmp.lt.s32.totalorder %v1489_v9, 17  ;;  %v28_v24 = vand.u32 15, %v1489_v9 }
   0x6   :  { %1335 = vrot.lane.b32.xlu0 %v1334_v4, %s1419_s22  ;;  %1345 = vrot.lane.b32.xlu1 %v1334_v4, %s1420_s23  ;;  %v33_v13 = vshra.s32 %v25_v10, 4  ;;  %v29_v14 = vand.u32 15, %v25_v10  ;;  %v35_v15 = vshra.s32 %v27_v11, 4  ;;  %v31_v20 = vand.u32 15, %v27_v11 }
   0x7   :  { %v34_v17 = vshra.s32 %v26_v12, 4  ;;  %v1503_v22 = vand.u32 15, %v32_v16  ;;  %vm88_vm4 = vcmp.lt.s32.totalorder %v1489_v9, 16  ;;  %v30_v28 = vand.u32 15, %v26_v12 }
   0x8   :  { %v1495_v18 = vand.u32 15, %v33_v13  ;;  %vm1497_vm0 = vcmp.ge.s32.totalorder %v29_v14, 1  ;;  %v1501_v21 = vand.u32 15, %v35_v15  ;;  %vm1511_vm5 = vcmp.lt.s32.totalorder %v29_v14, 15 }
   0x9   :  { %v1506_v23 = vand.u32 15, %v34_v17  ;;  %v1882_v27 = vsel %vm1511_vm5, 4294967295, %v1881_v27  ;;  %vm1520_vm8 = vcmp.ge.s32.totalorder %v31_v20, 1  ;;  %vm1524_vm9 = vcmp.lt.s32.totalorder %v31_v20, 15 }
   0xa   :  { %1340 = vrot.lane.b32.xlu0 %v1339_v5, %s1419_s22  ;;  %1350 = vrot.lane.b32.xlu1 %v1339_v5, %s1420_s23  ;;  %vm1868_vm3 = vcmp.ge.s32.totalorder %v1495_v18, 1  ;;  %vm1869_vm7 = vcmp.ge.s32.totalorder %v1501_v21, 1  ;;  %v1886_v34 = vsel %vm1524_vm9, 4294967295, %v1885_v34  ;;  %vm59_vm10 = vcmp.ge.s32.totalorder %v1503_v22, 1 }
   0xb   :  { %vm68_vm6 = vmand %vm1868_vm3, %vm1497_vm0  ;;  %vm1871_vm11 = vcmp.ge.s32.totalorder %v1506_v23, 1  ;;  %vm1534_vm12 = vcmp.ge.s32.totalorder %v28_v24, 1  ;;  %vm1540_vm14 = vcmp.ge.s32.totalorder %v30_v28, 1 }
   0xc   :  { %vm1557_vm13 = vmand %vm59_vm10, %vm1534_vm12 }
   0xd   :  { %vm69_vm15 = vmand %vm1871_vm11, %vm1540_vm14 }
   0xe   :  { %1360 = vrot.lane.b32.xlu1 %v1339_v5, %s1422_s0  ;;  %1355 = vrot.lane.b32.xlu0 %v1334_v4, %s1422_s0 }
  0x12   :  { %1370 = vrot.lane.b32.xlu1 %v1339_v5, %s1423_s24  ;;  %1365 = vrot.lane.b32.xlu0 %v1334_v4, %s1423_s24 }
  0x16   :  { %1380 = vrot.lane.b32.xlu1 %v1339_v5, %s1424_s25  ;;  %1375 = vrot.lane.b32.xlu0 %v1334_v4, %s1424_s25 }
  0x1a   :  { %1390 = vrot.lane.b32.xlu1 %v1339_v5, %s1425_s26  ;;  %1385 = vrot.lane.b32.xlu0 %v1334_v4, %s1425_s26 }
  0x1e   :  { %1400 = vrot.lane.b32.xlu1 %v1339_v5, %s1426_s27  ;;  %1395 = vrot.lane.b32.xlu0 %v1334_v4, %s1426_s27 }
  0x22   :  { %1410 = vrot.lane.b32.xlu1 %v1339_v5, %s1427_s28  ;;  %1405 = vrot.lane.b32.xlu0 %v1334_v4, %s1427_s28 }
  0x26   :  { %1173 = vperm.xlu0 %1414, %v1170_v7  }
  0x78   :  { %v1336_v25 = vpop.permute.xlu0 %1335  ;;  %v1346_v26 = vpop.permute.xlu1 %1345 }
  0x79   :  { %v1338_v29 = vunpack.i.h.bf16 %v1336_v25  ;;  %v1337_v30 = vunpack.i.l.bf16 %v1336_v25  ;;  %v1348_v31 = vunpack.i.h.bf16 %v1346_v26  ;;  %v1347_v32 = vunpack.i.l.bf16 %v1346_v26  ;;  %v1269_v25 = vld [vmem:[%s1864_s1 + $0x4] sm:$0xf] }
  0x7b   :  { %v57_v35 = vsel %vm54_vm1, %v1347_v32, %v1348_v31  ;;  %v91_v36 = vsel %vm88_vm4, %v1337_v30, %v1338_v29 }
  0x7c   :  { %v1341_v38 = vpop.permute.xlu0 %1340  ;;  %v72_v39 = vsel %vm68_vm6, %v57_v35, 0.0  ;;  %v94_v40 = vsel %vm1868_vm3, %v91_v36, 0.0  ;;  %v1351_v41 = vpop.permute.xlu1 %1350  ;;  %vm1549_vm6 = vmand %vm1869_vm7, %vm1520_vm8  ;;  %vm1562_vm3 = vcmp.lt.s32.totalorder %v28_v24, 15  ;;  %vm1566_vm7 = vcmp.lt.s32.totalorder %v30_v28, 15 }
  0x7d   :  { %v1343_v43 = vunpack.i.h.bf16 %v1341_v38  ;;  %v1342_v44 = vunpack.i.l.bf16 %v1341_v38  ;;  %v100_v45 = vpack.c.bf16 %v94_v40, %v94_v40  ;;  %v1353_v46 = vunpack.i.h.bf16 %v1351_v41 }
  0x7e   :  { %v1352_v48 = vunpack.i.l.bf16 %v1351_v41  ;;  %v77_v49 = vpack.c.bf16 %v72_v39, %v72_v39  ;;  %v1896_v51 = vsel %vm1562_vm3, 4294967295, %v1895_v51 }
  0x7f   :  { %1270 = vmatprep.subr.msk.bf16.mxu0 %vm1870_vm2, %v100_v45  ;;  %v58_v53 = vsel %vm54_vm1, %v1353_v46, %v1347_v32  ;;  %v89_v54 = vsel %vm88_vm4, %v1342_v44, %v1343_v43  ;;  %v92_v55 = vsel %vm88_vm4, %v1343_v43, %v1337_v30  ;;  %v90_v56 = vsel %vm88_vm4, %v1338_v29, %v1342_v44 }
  0x80   :  { %v55_v57 = vsel %vm54_vm1, %v1352_v48, %v1353_v46  ;;  %v56_v58 = vsel %vm54_vm1, %v1348_v31, %v1352_v48  ;;  %vm1899_vm2 = vcmp.ge.s32.totalorder %v1501_v21, 1  ;;  %v93_v60 = vsel %vm59_vm10, %v92_v55, 0.0  ;;  %v1361_v61 = vpop.permute.xlu1 %1360  ;;  %v1356_v62 = vpop.permute.xlu0 %1355 }
  0x81   :  { %v96_v59 = vsel %vm1899_vm2, %v89_v54, 0.0  ;;  %v74_v63 = vsel %vm1549_vm6, %v55_v57, 0.0  ;;  %v99_v5 = vpack.c.bf16 %v93_v60, %v93_v60  ;;  %v95_v7 = vsel %vm1871_vm11, %v90_v56, 0.0 }
  0x82   :  { %v102_v4 = vpack.c.bf16 %v96_v59, %v96_v59  ;;  %v101_v8 = vpack.c.bf16 %v95_v7, %v95_v7  ;;  %v79_v10 = vpack.c.bf16 %v74_v63, %v74_v63  ;;  %v71_v11 = vsel %vm1557_vm13, %v58_v53, 0.0 }
  0x83   :  { %v73_v12 = vsel %vm69_vm15, %v56_v58, 0.0  ;;  %vm1900_vm1 = vcmp.ge.s32.totalorder %v1495_v18, 1  ;;  %vm1903_vm4 = vcmask 1041408   ;;  %v76_v15 = vpack.c.bf16 %v71_v11, %v71_v11 }
  0x84   :  { %vm1601_vm2 = vmand %vm1900_vm1, %vm1511_vm5  ;;  %1272 = vmatprep.subr.msk.bf16.mxu1 %vm1903_vm4, %v102_v4  ;;  %v78_v16 = vpack.c.bf16 %v73_v12, %v73_v12  ;;  %v1363_v17 = vunpack.i.h.bf16 %v1361_v61  ;;  %vm1905_vm13 = vcmp.ge.s32.totalorder %v1501_v21, 1  ;;  %v1362_v26 = vunpack.i.l.bf16 %v1361_v61  ;;  %v1371_v30 = vpop.permute.xlu1 %1370  ;;  %v1366_v31 = vpop.permute.xlu0 %1365  ;;  %v75_v61 = vld [vmem:[%s1864_s1] sm:$0xf] }
  0x85   :  { %vm1904_vm6 = vmmov %vm1903_vm4  ;;  %v1358_v28 = vunpack.i.h.bf16 %v1356_v62  ;;  %v1357_v29 = vunpack.i.l.bf16 %v1356_v62  ;;  %v1373_v36 = vunpack.i.h.bf16 %v1371_v30  ;;  %v1372_v38 = vunpack.i.l.bf16 %v1371_v30 }
  0x86   :  { %v109_v14 = vsel %vm1904_vm6, %v99_v5, 0  ;;  %vm1611_vm15 = vmand %vm1905_vm13, %vm1524_vm9  ;;  %vm1915_vm9 = vcmp.lt.s32.totalorder %v1489_v9, 15  ;;  %vm1920_vm5 = vcmask 31744   ;;  %v1368_v47 = vunpack.i.h.bf16 %v1366_v31 }
  0x87   :  { %121 = vmatpush1.bf16.msra.mxu0 %v109_v14  ;;  %vm1908_vm1 = vmmov %vm1903_vm4  ;;  %v308_v40 = vsel %vm1915_vm9, %v1362_v26, %v1363_v17  ;;  %v1367_v50 = vunpack.i.l.bf16 %v1366_v31  ;;  %v560_v30 = vpack.c.bf16 %v1476_v3, %v1476_v3  ;;  %v559_v3 = vpack.c.bf16 %v1468_v1, %v1468_v1 }
  0x88   :  { %v115_v24 = vsel %vm1908_vm1, %v101_v8, 0  ;;  %vm1909_vm4 = vmmov %vm1908_vm1  ;;  %v323_v45 = vsel %vm1611_vm15, %v308_v40, 0.0  ;;  %v1381_v13 = vpop.permute.xlu1 %1380  ;;  %v1376_v14 = vpop.permute.xlu0 %1375 }
  0x89   :  { %162 = vmatpush1.bf16.msra.mxu1 %v115_v24  ;;  %1274 = vmatprep.subr.msk.bf16.mxu0 %vm1909_vm4, %v77_v49  ;;  %vm1910_vm6 = vmmov %vm1908_vm1  ;;  %v329_v49 = vpack.c.bf16 %v323_v45, %v323_v45  ;;  %v1378_v20 = vunpack.i.h.bf16 %v1376_v14 }
  0x8a   :  { %v206_v32 = vsel %vm1910_vm6, %v76_v15, 0  ;;  %vm1911_vm13 = vmmov %vm1908_vm1  ;;  %1271 = vmatmul.mubr.msk.bf16.vlgmr.msra.gmra.mrb[0].mxu0 %vm1920_vm5, %v1269_v25 }
  0x8b   :  { %v212_v35 = vsel %vm1911_vm13, %v78_v16, 0  ;;  %vm1626_vm1 = vmand %vm59_vm10, %vm1562_vm3  ;;  %vm1919_vm10 = vcmp.ge.s32.totalorder %v1506_v23, 1  ;;  %218 = vmatpush1.bf16.msra.mxu0 %v206_v32  ;;  %249 = vmatprep.mubr.bf16.mxu0 %v1421_v6  ;;  %v1278_v16 = vld [vmem:[%s1864_s1 + $0x8] sm:$0xf] }
  0x8c   :  { %vm1914_vm11 = vmmov %vm1909_vm4 }
  0x8d   :  { %1276 = vmatprep.subr.msk.bf16.mxu1 %vm1914_vm11, %v79_v10  ;;  %vm1916_vm4 = vmmov %vm1915_vm9  ;;  %vm1922_vm11 = vcmp.lt.s32.totalorder %v1489_v9, 1 }
  0x8e   :  { %v309_v41 = vsel %vm1916_vm4, %v1358_v28, %v1362_v26  ;;  %vm1917_vm6 = vmmov %vm1916_vm4  ;;  %v440_v53 = vsel %vm1922_vm11, %v1372_v38, %v1373_v36  ;;  %v1377_v26 = vunpack.i.l.bf16 %v1376_v14 }
  0x8f   :  { %v310_v43 = vsel %vm1917_vm6, %v1357_v29, %v1358_v28  ;;  %vm1918_vm13 = vmmov %vm1916_vm4  ;;  %v447_v62 = vsel %vm1520_vm8, %v440_v53, 0.0 }
  0x90   :  { %v311_v44 = vsel %vm1918_vm13, %v1363_v17, %v1357_v29  ;;  %vm318_vm3 = vmand %vm1919_vm10, %vm1566_vm7  ;;  %v321_v46 = vsel %vm1601_vm2, %v310_v43, 0.0  ;;  %v453_v10 = vpack.c.bf16 %v447_v62, %v447_v62  ;;  %v1382_v17 = vunpack.i.l.bf16 %v1381_v13 }
  0x91   :  { %vm1921_vm9 = vmmov %vm1920_vm5  ;;  %v327_v48 = vpack.c.bf16 %v321_v46, %v321_v46  ;;  %v320_v54 = vsel %vm1626_vm1, %v311_v44, 0.0  ;;  %v322_v55 = vsel %vm318_vm3, %v309_v41, 0.0  ;;  %vm1923_vm5 = vcmask 1041408  }
  0x92   :  { %1273 = vmatmul.mubr.msk.bf16.vlgmr.msra.gmra.mrb[0].mxu1 %vm1921_vm9, %v1269_v25  ;;  %vm1924_vm2 = vmmov %vm1922_vm11  ;;  %v326_v57 = vpack.c.bf16 %v320_v54, %v320_v54  ;;  %v328_v60 = vpack.c.bf16 %v322_v55, %v322_v55  ;;  %v1383_v25 = vunpack.i.h.bf16 %v1381_v13  ;;  %v558_v29 = vpack.c.bf16 %v1472_v2, %v1472_v2 }
  0x93   :  { %259 = vmatpush1.bf16.msra.mxu1 %v212_v35  ;;  %290 = vmatprep.mubr.bf16.mxu1 %v1421_v6  ;;  %v442_v56 = vsel %vm1924_vm2, %v1367_v50, %v1368_v47  ;;  %vm1925_vm15 = vmmov %vm1923_vm5  ;;  %v557_v2 = vpack.c.bf16 %v1463_v0, %v1463_v0  ;;  %v1391_v35 = vpop.permute.xlu1 %1390  ;;  %v1283_v0 = vld [vmem:[%s1864_s1 + $0xc] sm:$0xf] }
  0x94   :  { %1279 = vmatprep.subr.msk.bf16.mxu0 %vm1923_vm5, %v327_v48  ;;  %1281 = vmatprep.subr.msk.bf16.mxu1 %vm1925_vm15, %v329_v49  ;;  %vm1926_vm4 = vmmov %vm1924_vm2  ;;  %v445_v59 = vsel %vm1497_vm0, %v442_v56, 0.0  ;;  %v1392_v41 = vunpack.i.l.bf16 %v1391_v35  ;;  %v1393_v45 = vunpack.i.h.bf16 %v1391_v35 }
  0x95   :  { %v443_v58 = vsel %vm1926_vm4, %v1373_v36, %v1367_v50  ;;  %vm1927_vm3 = vmmov %vm1924_vm2  ;;  %v451_v7 = vpack.c.bf16 %v445_v59, %v445_v59  ;;  %vm670_vm2 = vcmp.lt.s32.totalorder %v1489_v9, 127  ;;  %v1386_v36 = vpop.permute.xlu0 %1385 }
  0x96   :  { %v441_v63 = vsel %vm1927_vm3, %v1368_v47, %v1372_v38  ;;  %vm1928_vm1 = vmmov %vm1923_vm5  ;;  %v444_v8 = vsel %vm1534_vm12, %v443_v58, 0.0  ;;  %v672_v31 = vsel %vm670_vm2, %v1378_v20, %v1382_v17  ;;  %v674_v32 = vsel %vm670_vm2, %v1383_v25, %v1377_v26 }
  0x97   :  { %v334_v4 = vsel %vm1928_vm1, %v326_v57, 0  ;;  %vm1929_vm6 = vmmov %vm1928_vm1  ;;  %v446_v11 = vsel %vm1540_vm14, %v441_v63, 0.0  ;;  %v450_v12 = vpack.c.bf16 %v444_v8, %v444_v8  ;;  %v673_v39 = vsel %vm670_vm2, %v1377_v26, %v1378_v20  ;;  %v1401_v56 = vpop.permute.xlu1 %1400  ;;  %v1293_v26 = vld [vmem:[%s1864_s1 + $0x14] sm:$0xf] }
  0x98   :  { %v340_v5 = vsel %vm1929_vm6, %v328_v60, 0  ;;  %vm1930_vm13 = vmmov %vm1921_vm9  ;;  %v452_v15 = vpack.c.bf16 %v446_v11, %v446_v11  ;;  %vm800_vm6 = vcmp.lt.s32.totalorder %v1495_v18, 15  ;;  %v671_v40 = vsel %vm670_vm2, %v1382_v17, %v1383_v25  ;;  %v1288_v60 = vld [vmem:[%s1864_s1 + $0x10] sm:$0xf] }
  0x99   :  { %1275 = vmatmul.mubr.msk.bf16.vlgmr.msra.gmra.mrb[4].mxu0 %vm1930_vm13, %v75_v61  ;;  %vm1931_vm10 = vmmov %vm1921_vm9  ;;  %v1388_v43 = vunpack.i.h.bf16 %v1386_v36  ;;  %v1387_v46 = vunpack.i.l.bf16 %v1386_v36  ;;  %vm1944_vm2 = vcmask 31744   ;;  %v677_v53 = vsel %vm1566_vm7, %v671_v40, 0.0  ;;  %v1396_v57 = vpop.permute.xlu0 %1395 }
  0x9a   :  { %1277 = vmatmul.mubr.msk.bf16.vlgmr.msra.gmra.mrb[4].mxu1 %vm1931_vm10, %v75_v61  ;;  %346 = vmatpush1.bf16.msra.mxu0 %v334_v4  ;;  %vm1932_vm9 = vmmov %vm1928_vm1  ;;  %v683_v58 = vpack.c.bf16 %v677_v53, %v677_v53  ;;  %v1402_v63 = vunpack.i.l.bf16 %v1401_v56  ;;  %v1398_v4 = vunpack.i.h.bf16 %v1396_v57  ;;  %v1308_v53 = vld [vmem:[%s1864_s1 + $0x20] sm:$0xf] }
  0x9b   :  { %387 = vmatpush1.bf16.msra.mxu1 %v340_v5  ;;  %377 = vmatprep.mubr.bf16.mxu0 %v1421_v6  ;;  %vm1933_vm11 = vmmov %vm1928_vm1  ;;  %v1403_v5 = vunpack.i.h.bf16 %v1401_v56 }
  0x9c   :  { %418 = vmatprep.mubr.bf16.mxu1 %v1421_v6  ;;  %1284 = vmatprep.subr.msk.bf16.mxu0 %vm1932_vm9, %v451_v7  ;;  %vm1934_vm5 = vmmov %vm1928_vm1  ;;  %vm1940_vm9 = vnez %v1886_v34  ;;  %v1397_v7 = vunpack.i.l.bf16 %v1396_v57 }
  0x9d   :  { %1286 = vmatprep.subr.msk.bf16.mxu1 %vm1933_vm11, %v453_v10  ;;  %v458_v24 = vsel %vm1934_vm5, %v450_v12, 0  ;;  %vm1935_vm15 = vmmov %vm1928_vm1  ;;  %v678_v1 = vsel %vm1940_vm9, %v674_v32, 0.0  ;;  %vm794_vm5 = vcmp.lt.s32.totalorder %v1489_v9, 113  ;;  %v1406_v17 = vpop.permute.xlu0 %1405 }
  0x9e   :  { %v464_v28 = vsel %vm1935_vm15, %v452_v15, 0  ;;  %vm1936_vm4 = vmmov %vm1931_vm10  ;;  %vm1939_vm10 = vnez %v1882_v27  ;;  %vm802_vm15 = vcmp.lt.s32.totalorder %v1501_v21, 15  ;;  %v684_v50 = vpack.c.bf16 %v678_v1, %v678_v1  ;;  %v1298_v21 = vld [vmem:[%s1864_s1 + $0x18] sm:$0xf] }
  0x9f   :  { %vm1937_vm3 = vmmov %vm1936_vm4  ;;  %v676_v38 = vsel %vm1939_vm10, %v672_v31, 0.0  ;;  %v796_v54 = vsel %vm794_vm5, %v1388_v43, %v1392_v41  ;;  %v798_v55 = vsel %vm794_vm5, %v1393_v45, %v1387_v46  ;;  %v797_v33 = vsel %vm794_vm5, %v1387_v46, %v1388_v43 }
  0xa0   :  { %vm1938_vm13 = vmmov %vm1928_vm1  ;;  %v682_v48 = vpack.c.bf16 %v676_v38, %v676_v38  ;;  %v795_v61 = vsel %vm794_vm5, %v1392_v41, %v1393_v45  ;;  %v1408_v31 = vunpack.i.h.bf16 %v1406_v17  ;;  %v1407_v35 = vunpack.i.l.bf16 %v1406_v17 }
  0xa1   :  { %1280 = vmatmul.mubr.msk.bf16.vlgmr.msra.gmra.mrb[8].mxu0 %vm1936_vm4, %v1278_v16  ;;  %vm1941_vm11 = vmmov %vm1928_vm1 }
  0xa2   :  { %1282 = vmatmul.mubr.msk.bf16.vlgmr.msra.gmra.mrb[8].mxu1 %vm1937_vm3, %v1278_v16  ;;  %470 = vmatpush1.bf16.msra.mxu0 %v458_v24  ;;  %v565_v44 = vsel %vm1941_vm11, %v557_v2, 0  ;;  %vm1942_vm4 = vmmov %vm1928_vm1  ;;  %vm1943_vm3 = vnez %v1896_v51  ;;  %vm1878_vm11 = vcmp.lt.s32.totalorder %v1503_v22, 15  ;;  %v1411_v16 = vpop.permute.xlu1 %1410 }
  0xa3   :  { %511 = vmatpush1.bf16.msra.mxu1 %v464_v28  ;;  %501 = vmatprep.mubr.bf16.mxu0 %v1421_v6  ;;  %v571_v47 = vsel %vm1942_vm4, %v559_v3, 0  ;;  %v675_v49 = vsel %vm1943_vm3, %v673_v39, 0.0  ;;  %vm806_vm4 = vmand %vm802_vm15, %vm1520_vm8  ;;  %v1413_v2 = vunpack.i.h.bf16 %v1411_v16 }
  0xa4   :  { %542 = vmatprep.mubr.bf16.mxu1 %v1421_v6  ;;  %1289 = vmatprep.subr.msk.bf16.mxu0 %vm1928_vm1, %v558_v29  ;;  %vm1945_vm1 = vmmov %vm1944_vm2  ;;  %v681_v19 = vpack.c.bf16 %v675_v49, %v675_v49  ;;  %v810_v62 = vsel %vm806_vm4, %v798_v55, 0.0 }
  0xa5   :  { %1291 = vmatprep.subr.msk.bf16.mxu1 %vm1938_vm13, %v560_v30  ;;  %vm804_vm13 = vmand %vm800_vm6, %vm1497_vm0  ;;  %vm801_vm0 = vcmp.lt.s32.totalorder %v1506_v23, 15  ;;  %v816_v12 = vpack.c.bf16 %v810_v62, %v810_v62  ;;  %v1412_v30 = vunpack.i.l.bf16 %v1411_v16 }
  0xa6   :  { %v808_v59 = vsel %vm804_vm13, %v796_v54, 0.0  ;;  %vm803_vm8 = vmand %vm1878_vm11, %vm1534_vm12  ;;  %vm1950_vm11 = vcmask 31744  }
  0xa7   :  { %vm805_vm13 = vmand %vm801_vm0, %vm1540_vm14  ;;  %v814_v10 = vpack.c.bf16 %v808_v59, %v808_v59  ;;  %v807_v11 = vsel %vm803_vm8, %v797_v33, 0.0  ;;  %vm1050_vm8 = vcmp.lt.s32.totalorder %v1489_v9, 111 }
  0xa8   :  { %v809_v13 = vsel %vm805_vm13, %v795_v61, 0.0  ;;  %vm1951_vm5 = vmmov %vm1950_vm11  ;;  %v813_v15 = vpack.c.bf16 %v807_v11, %v807_v11  ;;  %v1052_v40 = vsel %vm1050_vm8, %v1408_v31, %v1412_v30  ;;  %v1054_v1 = vsel %vm1050_vm8, %v1413_v2, %v1407_v35 }
  0xa9   :  { %1285 = vmatmul.mubr.msk.bf16.vlgmr.msra.gmra.mrb[12].mxu0 %vm1944_vm2, %v1283_v0  ;;  %vm1946_vm2 = vcmask 1041408   ;;  %v815_v20 = vpack.c.bf16 %v809_v13, %v809_v13  ;;  %v1053_v43 = vsel %vm1050_vm8, %v1407_v35, %v1408_v31  ;;  %v1051_v34 = vsel %vm1050_vm8, %v1412_v30, %v1413_v2 }
  0xaa   :  { %1287 = vmatmul.mubr.msk.bf16.vlgmr.msra.gmra.mrb[12].mxu1 %vm1945_vm1, %v1283_v0  ;;  %577 = vmatpush1.bf16.msra.mxu0 %v565_v44  ;;  %vm1947_vm1 = vmmov %vm1946_vm2 }
  0xab   :  { %618 = vmatpush1.bf16.msra.mxu1 %v571_v47  ;;  %608 = vmatprep.mubr.bf16.mxu0 %v1421_v6 }
  0xac   :  { %649 = vmatprep.mubr.bf16.mxu1 %v1421_v6  ;;  %1294 = vmatprep.subr.msk.bf16.mxu0 %vm1946_vm2, %v682_v48  ;;  %vm1948_vm2 = vmmov %vm1947_vm1 }
  0xad   :  { %1296 = vmatprep.subr.msk.bf16.mxu1 %vm1947_vm1, %v684_v50  ;;  %v689_v37 = vsel %vm1948_vm2, %v681_v19, 0  ;;  %vm926_vm1 = vcmp.lt.s32.totalorder %v1489_v9, 112  ;;  %vm1949_vm12 = vmmov %vm1948_vm2 }
  0xae   :  { %v695_v8 = vsel %vm1949_vm12, %v683_v58, 0  ;;  %v928_v42 = vsel %vm926_vm1, %v1398_v4, %v1402_v63  ;;  %v930_v14 = vsel %vm926_vm1, %v1403_v5, %v1397_v7  ;;  %vm1952_vm14 = vmmov %vm1948_vm2  ;;  %v929_v25 = vsel %vm926_vm1, %v1397_v7, %v1398_v4 }
  0xaf   :  { %v932_v24 = vsel %vm800_vm6, %v928_v42, 0.0  ;;  %v927_v28 = vsel %vm926_vm1, %v1402_v63, %v1403_v5  ;;  %v934_v29 = vsel %vm802_vm15, %v930_v14, 0.0  ;;  %vm1954_vm4 = vmmov %vm1948_vm2 }
  0xb0   :  { %v821_v32 = vsel %vm1954_vm4, %v813_v15, 0  ;;  %vm1955_vm13 = vmmov %vm1948_vm2  ;;  %v938_v3 = vpack.c.bf16 %v932_v24, %v932_v24  ;;  %v940_v39 = vpack.c.bf16 %v934_v29, %v934_v29  ;;  %v933_v0 = vsel %vm801_vm0, %v927_v28, 0.0 }
  0xb1   :  { %1290 = vmatmul.mubr.msk.bf16.vlgmr.msra.gmra.mrb[16].mxu0 %vm1950_vm11, %v1288_v60  ;;  %vm1953_vm11 = vmmov %vm1948_vm2  ;;  %v827_v36 = vsel %vm1955_vm13, %v815_v20, 0  ;;  %vm1956_vm2 = vcmp.lt.s32.totalorder %v1503_v22, 15  ;;  %v939_v18 = vpack.c.bf16 %v933_v0, %v933_v0 }
  0xb2   :  { %1292 = vmatmul.mubr.msk.bf16.vlgmr.msra.gmra.mrb[16].mxu1 %vm1951_vm5, %v1288_v60  ;;  %701 = vmatpush1.bf16.msra.mxu0 %v689_v37  ;;  %v931_v38 = vsel %vm1956_vm2, %v929_v25, 0.0  ;;  %vm1957_vm12 = vmmov %vm1951_vm5 }
  0xb3   :  { %742 = vmatpush1.bf16.msra.mxu1 %v695_v8  ;;  %732 = vmatprep.mubr.bf16.mxu0 %v1421_v6  ;;  %vm1958_vm1 = vmmov %vm1951_vm5  ;;  %v937_v41 = vpack.c.bf16 %v931_v38, %v931_v38 }
  0xb4   :  { %773 = vmatprep.mubr.bf16.mxu1 %v1421_v6  ;;  %1299 = vmatprep.subr.msk.bf16.mxu0 %vm1952_vm14, %v814_v10  ;;  %vm1056_vm5 = vmand %vm800_vm6, %vm1939_vm10 }
  0xb5   :  { %1301 = vmatprep.subr.msk.bf16.mxu1 %vm1953_vm11, %v816_v12  ;;  %vm1058_vm14 = vmand %vm802_vm15, %vm1940_vm9  ;;  %v1060_v27 = vsel %vm1056_vm5, %v1052_v40, 0.0  ;;  %v945_v45 = vsel %vm1954_vm4, %v937_v41, 0 }
  0xb6   :  { %vm1959_vm11 = vmmov %vm1954_vm4  ;;  %v1062_v44 = vsel %vm1058_vm14, %v1054_v1, 0.0  ;;  %v1066_v46 = vpack.c.bf16 %v1060_v27, %v1060_v27 }
  0xb7   :  { %vm1960_vm6 = vmmov %vm1954_vm4  ;;  %v1068_v47 = vpack.c.bf16 %v1062_v44, %v1062_v44 }
  0xb8   :  { %vm1961_vm10 = vmmov %vm1956_vm2 }
  0xb9   :  { %1295 = vmatmul.mubr.msk.bf16.vlgmr.msra.gmra.mrb[20].mxu0 %vm1957_vm12, %v1293_v26  ;;  %vm1055_vm9 = vmand %vm1961_vm10, %vm1943_vm3  ;;  %vm1190_vm10 = vcmask 7168  }
  0xba   :  { %1297 = vmatmul.mubr.msk.bf16.vlgmr.msra.gmra.mrb[20].mxu1 %vm1958_vm1, %v1293_v26  ;;  %833 = vmatpush1.bf16.msra.mxu0 %v821_v32  ;;  %vm1057_vm15 = vmand %vm801_vm0, %vm1566_vm7  ;;  %v1059_v22 = vsel %vm1055_vm9, %v1053_v43, 0.0  ;;  %vm1217_vm9 = vcmask 1043456  }
  0xbb   :  { %874 = vmatpush1.bf16.msra.mxu1 %v827_v36  ;;  %864 = vmatprep.mubr.bf16.mxu0 %v1421_v6  ;;  %vm1962_vm13 = vmmov %vm1954_vm4  ;;  %v1061_v48 = vsel %vm1057_vm15, %v1051_v34, 0.0  ;;  %v1065_v9 = vpack.c.bf16 %v1059_v22, %v1059_v22  ;;  %vm1213_vm15 = vcmask 64512  }
  0xbc   :  { %905 = vmatprep.mubr.bf16.mxu1 %v1421_v6  ;;  %1304 = vmatprep.subr.msk.bf16.mxu0 %vm1959_vm11, %v938_v3  ;;  %v951_v51 = vsel %vm1962_vm13, %v939_v18, 0  ;;  %vm1963_vm3 = vmmov %vm1958_vm1  ;;  %v1067_v23 = vpack.c.bf16 %v1061_v48, %v1061_v48 }
  0xbd   :  { %1306 = vmatprep.subr.msk.bf16.mxu1 %vm1960_vm6, %v940_v39  ;;  %vm1964_vm2 = vmmov %vm1958_vm1  ;;  %vm1429_vm6 = vmmov 0  }
  0xbe   :  { %vm1965_vm7 = vmmov %vm1954_vm4 }
  0xbf   :  { %vm1966_vm0 = vmmov %vm1954_vm4  ;;  %vm1262_vm4 = vcmask 15360  }
  0xc0   :  { %vm1967_vm8 = vmmov %vm1966_vm0 }
  0xc1   :  { %1300 = vmatmul.mubr.msk.bf16.vlgmr.msra.gmra.mrb[24].mxu0 %vm1963_vm3, %v1298_v21  ;;  %v1073_v49 = vsel %vm1967_vm8, %v1065_v9, 0  ;;  %vm1968_vm12 = vmmov %vm1966_vm0 }
  0xc2   :  { %1302 = vmatmul.mubr.msk.bf16.vlgmr.msra.gmra.mrb[24].mxu1 %vm1964_vm2, %v1298_v21  ;;  %957 = vmatpush1.bf16.msra.mxu0 %v945_v45  ;;  %v1079_v50 = vsel %vm1968_vm12, %v1067_v23, 0  ;;  %vm1969_vm5 = vmmov %vm1958_vm1 }
  0xc3   :  { %998 = vmatpush1.bf16.msra.mxu1 %v951_v51  ;;  %988 = vmatprep.mubr.bf16.mxu0 %v1421_v6  ;;  %vm1970_vm14 = vmmov %vm1958_vm1 }
  0xc4   :  { %1029 = vmatprep.mubr.bf16.mxu1 %v1421_v6  ;;  %1309 = vmatprep.subr.msk.bf16.mxu0 %vm1965_vm7, %v1066_v46  ;;  %vm1971_vm11 = vmmov %vm1958_vm1 }
  0xc5   :  { %1311 = vmatprep.subr.msk.bf16.mxu1 %vm1966_vm0, %v1068_v47 }
  0xc9   :  { %1305 = vmatmul.mubr.msk.bf16.vlgmr.msra.gmra.mrb[28].mxu0 %vm1958_vm1, %v1303_v52 }
  0xca   :  { %1307 = vmatmul.mubr.msk.bf16.vlgmr.msra.gmra.mrb[28].mxu1 %vm1969_vm5, %v1303_v52  ;;  %1085 = vmatpush1.bf16.msra.mxu0 %v1073_v49 }
  0xcb   :  { %1126 = vmatpush1.bf16.msra.mxu1 %v1079_v50  ;;  %1116 = vmatprep.mubr.bf16.mxu0 %v1421_v6 }
  0xcc   :  { %1157 = vmatprep.mubr.bf16.mxu1 %v1421_v6 }
  0xd1   :  { %1310 = vmatmul.mubr.msk.bf16.vlgmr.msra.gmra.mrb[32].mxu0 %vm1970_vm14, %v1308_v53 }
  0xd2   :  { %1312 = vmatmul.mubr.msk.bf16.vlgmr.msra.gmra.mrb[32].mxu1 %vm1971_vm11, %v1308_v53 }
 0x15d   :  { %v154_v54 = vpop.f32.mrb[0].mxu0 }
 0x15e   :  { %v156_v19 = vpop.f32.mrb[1].mxu0 }
 0x15f   :  { %v158_v57 = vpop.f32.mrb[2].mxu0 }
 0x160   :  { %v159_v59 = vpop.f32.mrb[3].mxu0 }
 0x165   :  { %v195_v55 = vpop.f32.mrb[0].mxu1 }
 0x166   :  { %v197_v56 = vpop.f32.mrb[1].mxu1 }
 0x167   :  { %v199_v58 = vpop.f32.mrb[2].mxu1 }
 0x168   :  { %v200_v33 = vpop.f32.mrb[3].mxu1 }
 0x16c   :  { %v251_v60 = vpop.f32.mrb[4].mxu0 }
 0x16d   :  { %v252_v61 = vadd.f32 %v251_v60, %v154_v54  ;;  %v292_v62 = vpop.f32.mrb[4].mxu1  ;;  %v253_v6 = vpop.f32.mrb[5].mxu0 }
 0x16e   :  { %v293_v63 = vadd.f32 %v292_v62, %v195_v55  ;;  %v254_v4 = vadd.f32 %v253_v6, %v156_v19  ;;  %v294_v37 = vpop.f32.mrb[5].mxu1  ;;  %v255_v5 = vpop.f32.mrb[6].mxu0 }
 0x16f   :  { %v295_v7 = vadd.f32 %v294_v37, %v197_v56  ;;  %v296_v8 = vpop.f32.mrb[6].mxu1  ;;  %v256_v10 = vpop.f32.mrb[7].mxu0 }
 0x170   :  { %v297_v11 = vpop.f32.mrb[7].mxu1 }
 0x174   :  { %v379_v12 = vpop.f32.mrb[8].mxu0 }
 0x175   :  { %v427_v13 = vadd.f32 %v379_v12, %v252_v61  ;;  %v420_v42 = vpop.f32.mrb[8].mxu1  ;;  %v381_v14 = vpop.f32.mrb[9].mxu0 }
 0x176   :  { %v429_v15 = vadd.f32 %v420_v42, %v293_v63  ;;  %v428_v16 = vadd.f32 %v381_v14, %v254_v4  ;;  %v422_v17 = vpop.f32.mrb[9].mxu1  ;;  %v383_v20 = vpop.f32.mrb[10].mxu0 }
 0x177   :  { %v430_v24 = vadd.f32 %v422_v17, %v295_v7  ;;  %v424_v25 = vpop.f32.mrb[10].mxu1  ;;  %v384_v26 = vpop.f32.mrb[11].mxu0 }
 0x178   :  { %v425_v28 = vpop.f32.mrb[11].mxu1  ;;  %v1174_v25 = vpop.permute.xlu0 %1173 }
 0x17c   :  { %v503_v29 = vpop.f32.mrb[12].mxu0 }
 0x17d   :  { %v551_v30 = vadd.f32 %v503_v29, %v427_v13  ;;  %v544_v31 = vpop.f32.mrb[12].mxu1  ;;  %v505_v32 = vpop.f32.mrb[13].mxu0 }
 0x17e   :  { %v553_v2 = vadd.f32 %v544_v31, %v429_v15  ;;  %v552_v35 = vadd.f32 %v505_v32, %v428_v16  ;;  %v546_v36 = vpop.f32.mrb[13].mxu1  ;;  %v507_v3 = vpop.f32.mrb[14].mxu0 }
 0x17f   :  { %v554_v38 = vadd.f32 %v546_v36, %v430_v24  ;;  %v548_v39 = vpop.f32.mrb[14].mxu1  ;;  %v508_v0 = vpop.f32.mrb[15].mxu0 }
 0x180   :  { %v549_v40 = vpop.f32.mrb[15].mxu1 }
 0x184   :  { %v610_v1 = vpop.f32.mrb[16].mxu0 }
 0x185   :  { %v658_v41 = vadd.f32 %v610_v1, %v551_v30  ;;  %v651_v18 = vpop.f32.mrb[16].mxu1  ;;  %v612_v27 = vpop.f32.mrb[17].mxu0 }
 0x186   :  { %v660_v43 = vadd.f32 %v651_v18, %v553_v2  ;;  %v659_v21 = vadd.f32 %v612_v27, %v552_v35  ;;  %v653_v34 = vpop.f32.mrb[17].mxu1  ;;  %v614_v44 = vpop.f32.mrb[18].mxu0 }
 0x187   :  { %v661_v45 = vadd.f32 %v653_v34, %v554_v38  ;;  %v655_v51 = vpop.f32.mrb[18].mxu1  ;;  %v615_v46 = vpop.f32.mrb[19].mxu0  ;;  %v1428_v44 = vmov 0.0  }
 0x188   :  { %v656_v22 = vpop.f32.mrb[19].mxu1  ;;  %1317 = vmatprep.subr.bf16.mxu0 %v1428_v44  ;;  %1319 = vmatprep.mubr.msk.bf16.mxu0 %vm1429_vm6, %v1428_v44  ;;  %v1196_v51 = vld [vmem:[%s1865_s4] sm:$0xff] }
 0x18c   :  { %v734_v47 = vpop.f32.mrb[20].mxu0 }
 0x18d   :  { %v782_v48 = vadd.f32 %v734_v47, %v658_v41  ;;  %v775_v9 = vpop.f32.mrb[20].mxu1  ;;  %v736_v23 = vpop.f32.mrb[21].mxu0 }
 0x18e   :  { %v784_v52 = vadd.f32 %v775_v9, %v660_v43  ;;  %v783_v49 = vadd.f32 %v736_v23, %v659_v21  ;;  %v777_v50 = vpop.f32.mrb[21].mxu1  ;;  %v738_v53 = vpop.f32.mrb[22].mxu0 }
 0x18f   :  { %v785_v54 = vadd.f32 %v777_v50, %v661_v45  ;;  %v779_v55 = vpop.f32.mrb[22].mxu1  ;;  %v739_v19 = vpop.f32.mrb[23].mxu0  ;;  %v1197_v45 = vld [vmem:[%s1865_s4 + $0x8] sm:$0xff] }
 0x190   :  { %v780_v56 = vpop.f32.mrb[23].mxu1 }
 0x194   :  { %v866_v57 = vpop.f32.mrb[24].mxu0 }
 0x195   :  { %v914_v58 = vadd.f32 %v866_v57, %v782_v48  ;;  %v907_v59 = vpop.f32.mrb[24].mxu1  ;;  %v868_v33 = vpop.f32.mrb[25].mxu0 }
 0x196   :  { %v916_v60 = vadd.f32 %v907_v59, %v784_v52  ;;  %v915_v61 = vadd.f32 %v868_v33, %v783_v49  ;;  %v909_v62 = vpop.f32.mrb[25].mxu1  ;;  %v870_v6 = vpop.f32.mrb[26].mxu0  ;;  %v1418_v52 = vld [vmem:[%s1866_s3] sm:$0xff]  }
 0x197   :  { %v917_v63 = vadd.f32 %v909_v62, %v785_v54  ;;  %v911_v4 = vpop.f32.mrb[26].mxu1  ;;  %v871_v37 = vpop.f32.mrb[27].mxu0 }
 0x198   :  { %v912_v5 = vpop.f32.mrb[27].mxu1 }
 0x19c   :  { %v990_v7 = vpop.f32.mrb[28].mxu0 }
 0x19d   :  { %v1038_v8 = vadd.f32 %v990_v7, %v914_v58  ;;  %v1031_v10 = vpop.f32.mrb[28].mxu1  ;;  %v992_v11 = vpop.f32.mrb[29].mxu0 }
 0x19e   :  { %v1040_v12 = vadd.f32 %v1031_v10, %v916_v60  ;;  %v1039_v13 = vadd.f32 %v992_v11, %v915_v61  ;;  %v1033_v42 = vpop.f32.mrb[29].mxu1  ;;  %v994_v14 = vpop.f32.mrb[30].mxu0 }
 0x19f   :  { %v1041_v15 = vadd.f32 %v1033_v42, %v917_v63  ;;  %v1035_v16 = vpop.f32.mrb[30].mxu1  ;;  %v995_v17 = vpop.f32.mrb[31].mxu0 }
 0x1a0   :  { %v1036_v20 = vpop.f32.mrb[31].mxu1 }
 0x1a4   :  { %v1118_v24 = vpop.f32.mrb[32].mxu0 }
 0x1a5   :  { %v1166_v26 = vadd.f32 %v1118_v24, %v1038_v8  ;;  %v1159_v28 = vpop.f32.mrb[32].mxu1  ;;  %v1120_v29 = vpop.f32.mrb[33].mxu0 }
 0x1a6   :  { %v1168_v30 = vadd.f32 %v1159_v28, %v1040_v12  ;;  %v1167_v31 = vadd.f32 %v1120_v29, %v1039_v13  ;;  %v1161_v32 = vpop.f32.mrb[33].mxu1  ;;  %v1122_v2 = vpop.f32.mrb[34].mxu0 }
 0x1a7   :  { %v1169_v35 = vadd.f32 %v1161_v32, %v1041_v15  ;;  %v1163_v36 = vpop.f32.mrb[34].mxu1  ;;  %v1123_v3 = vpop.f32.mrb[35].mxu0  ;;  %v1176_v38 = vadd.f32 %v1174_v25, %v1166_v26 }
 0x1a8   :  { %v1164_v39 = vpop.f32.mrb[35].mxu1  ;;  %v1178_v0 = vadd.f32 %v1174_v25, %v1168_v30  ;;  %v1177_v40 = vadd.f32 %v1174_v25, %v1167_v31 }
 0x1a9   :  { %v1179_v1 = vadd.f32 %v1174_v25, %v1169_v35  ;;  %v1180_v41 = vmax.f32 %v1176_v38, 0.0 }
 0x1aa   :  { %v1182_v18 = vmax.f32 %v1178_v0, 0.0  ;;  %v1181_v27 = vmax.f32 %v1177_v40, 0.0 }
 0x1ab   :  { %v1183_v43 = vmax.f32 %v1179_v1, 0.0 }
 0x1ac   :  { %v1184_v21 = vadd.f32 %v1181_v27, %v1180_v41 }
 0x1ad   :  { %v1187_v34 = vadd.f32 %v1183_v43, %v1182_v18 }
 0x1ae   :  { %1185 = vadd.xlane.f32.xlu1 %v1184_v21 }
 0x1af   :  { %1188 = vadd.xlane.f32.xlu0 %v1187_v34 }
 0x1bf   :  { %1200 = vperm.xlu1 %1415, %v1196_v51  }
 0x1c5   :  { %1205 = vperm.xlu0 %1414, %v1197_v45  }
 0x23b   :  { %v1186_v46 = vpop.xlane.xlu1 %1185 }
 0x23c   :  { %v1189_v22 = vpop.xlane.xlu0 %1188 }
 0x23d   :  { %v1191_v47 = vsel %vm1190_vm10, %v1186_v46, %v1189_v22 }
 0x23e   :  { %v1192_v48 = vmul.f32 0.00390625, %v1191_v47 }
 0x23f   :  { %v1201_v49 = vpop.permute.xlu1 %1200 }
 0x240   :  { %v1195_v9 = vpack.c.bf16 %v1192_v48, %v1192_v48 }
 0x242   :  { %v1219_v23 = vsel %vm1217_vm9, %v1195_v9, 0 }
 0x243   :  { %1318 = vmatpush3.bf16.msra.mxu0 %v1219_v23 }
 0x244   :  { %v1206_v55 = vpop.permute.xlu0 %1205 }
 0x246   :  { %1320 = vmatmul.mubr.msk.bf16.vlgmr.msra.gmra.mrb[36].mxu0 %vm1213_vm15, %v1418_v52 }
 0x319   :  { %v1255_v50 = vpop.f32.mrb[36].mxu0 }
 0x31a   :  { %v1321_v53 = vpop.f32.mrb[37].mxu0  ;;  %v1256_v54 = vadd.f32 %v1255_v50, %v1201_v49 }
 0x31b   :  { %v1258_v19 = vpop.f32.mrb[38].mxu0 }
 0x31c   :  { %v1259_v56 = vadd.f32 %v1258_v19, %v1206_v55  ;;  %1263 = vst.msk [vmem:[%s1867_s5] sm:$0xff] %vm1262_vm4, %v1256_v54  ;;  %v1322_v57 = vpop.f32.mrb[39].mxu0 }
 0x31e   :  { %1264 = vst.msk [vmem:[%s1867_s5 + $0x8] sm:$0xff] %vm1262_vm4, %v1259_v56 }

</bundles_post_ra>
